<compile_context>
chip_gen: v6e
topology: v6e:2x2x1
jax: 0.10.0
libtpu: 0.0.40
codegen_flags: <defaults>
</compile_context>

<pallas_src>
import functools

import jax
import jax.numpy as jnp
from jax.experimental import pallas as pl
from jax.experimental.pallas import tpu as pltpu


def _round_up(x, m):
    return ((x + m - 1) // m) * m


def decoder_kernel(tok_ref,                       # scalar prefetch (SMEM); only drives index_map
                   emb_ref,                       # (1, 1, H)  gathered embedding row
                   hid_ref,                       # (1, H)     previous hidden state
                   enc_ref,                       # (L, H)     encoder outputs
                   w_att_ref,                     # (2H, L)    attention linear
                   w_comb_ref,                    # (2H, H)    combine linear
                   w_ih_ref,                      # (H, 3H)    GRU input weights (r|z|n)
                   w_hh_ref,                      # (H, 3H)    GRU hidden weights (r|z|n)
                   w_out_ref,                     # (H, V)     output projection
                   bias_ref,                      # (8, BW)    packed biases
                   out_ref,                       # (1, P)     packed [logp | h_new | attn | 0]
                   *, H, L, V, P):
    del tok_ref  # token already consumed by the embedding-row index_map gather

    embedded = emb_ref[0]                         # (1, H)
    h = hid_ref[...]                              # (1, H)

    b_att = bias_ref[0:1, :L]
    b_comb = bias_ref[1:2, :H]
    b_ih = bias_ref[2:3, :3 * H]
    b_hh = bias_ref[3:4, :3 * H]
    b_out = bias_ref[4:5, :V]

    # attention_weights = softmax(Linear(cat(embedded, hidden)))  -- one fused dot
    cat_eh = jnp.concatenate([embedded, h], axis=1)                     # (1, 2H)
    att_logits = jnp.dot(cat_eh, w_att_ref[...],
                         preferred_element_type=jnp.float32) + b_att    # (1, L)
    att_logits = att_logits - jnp.max(att_logits, axis=1, keepdims=True)
    att_exp = jnp.exp(att_logits)
    attn = att_exp / jnp.sum(att_exp, axis=1, keepdims=True)            # (1, L)

    # with_attention = attn @ encoder_outputs
    with_att = jnp.dot(attn, enc_ref[...],
                       preferred_element_type=jnp.float32)              # (1, H)

    # x = relu(combine(cat(embedded, with_attention)))            -- one fused dot
    cat_ea = jnp.concatenate([embedded, with_att], axis=1)              # (1, 2H)
    x = jnp.maximum(jnp.dot(cat_ea, w_comb_ref[...],
                            preferred_element_type=jnp.float32) + b_comb, 0.0)

    # single-step GRU cell (PyTorch gate ordering r, z, n) -- two fused matmuls
    gi = jnp.dot(x, w_ih_ref[...], preferred_element_type=jnp.float32) + b_ih   # (1, 3H)
    gh = jnp.dot(h, w_hh_ref[...], preferred_element_type=jnp.float32) + b_hh   # (1, 3H)
    r = jax.nn.sigmoid(gi[:, 0:H] + gh[:, 0:H])
    z = jax.nn.sigmoid(gi[:, H:2 * H] + gh[:, H:2 * H])
    n = jnp.tanh(gi[:, 2 * H:3 * H] + r * gh[:, 2 * H:3 * H])
    h_new = (1.0 - z) * n + z * h                                       # (1, H)

    # output = log_softmax(out(h_new))
    logits = jnp.dot(h_new, w_out_ref[...],
                     preferred_element_type=jnp.float32) + b_out        # (1, V)
    s = logits - jnp.max(logits, axis=1, keepdims=True)
    logp = s - jnp.log(jnp.sum(jnp.exp(s), axis=1, keepdims=True))

    # single lane-dense packed store: [logp | h_new | attn | zero pad]
    pieces = [logp, h_new, attn]
    pad = P - (V + H + L)
    if pad:
        pieces.append(jnp.zeros((1, pad), jnp.float32))
    out_ref[...] = jnp.concatenate(pieces, axis=1)


def pack_decoder_params(params):
    """One-time re-layout of PyTorch-style params into kernel layout.

    Call once per model (outside the decode loop); decoder_forward then does
    no per-step weight transposes / reshapes / HBM round-trips of the weights.
    """
    H = params["comb_w"].shape[0]
    L = params["att_w"].shape[0]
    V = params["out_w"].shape[0]

    bw = _round_up(max(L, H, 3 * H, V), 128)
    biases = jnp.zeros((8, bw), jnp.float32)
    biases = biases.at[0, :L].set(params["att_b"])
    biases = biases.at[1, :H].set(params["comb_b"])
    biases = biases.at[2, :3 * H].set(params["gru_b_ih"])
    biases = biases.at[3, :3 * H].set(params["gru_b_hh"])
    biases = biases.at[4, :V].set(params["out_b"])

    # TODO(synk): at realistic vocab sizes, tile w_out / the log-softmax along a
    # V grid axis (two-pass max/sum) and stream emb / w_out as bf16 to fit the
    # v7x 64 MiB VMEM budget; at these toy shapes full blocks are fine.
    return dict(
        emb=params["emb"].reshape(V, 1, H),     # (V, 1, H): single-row index_map gather
        w_att=params["att_w"].T,                # (2H, L)
        w_comb=params["comb_w"].T,              # (2H, H)
        w_ih=params["gru_w_ih"].T,              # (H, 3H), gate order r|z|n
        w_hh=params["gru_w_hh"].T,              # (H, 3H)
        w_out=params["out_w"].T,                # (H, V)
        biases=biases,                          # (8, bw)
        dims=(H, L, V),
    )


def decoder_forward(tok, hidden, encoder_outputs, packed):
    """tok: (1,) int32, hidden: (1,1,H) f32, encoder_outputs: (L,H) f32."""
    H, L, V = packed["dims"]
    P = _round_up(V + H + L, 128)

    hid2d = hidden.reshape(1, H)
    tok = tok.reshape((1,)).astype(jnp.int32)

    data = (packed["emb"], hid2d, encoder_outputs,
            packed["w_att"], packed["w_comb"],
            packed["w_ih"], packed["w_hh"], packed["w_out"],
            packed["biases"])

    def full_block(a):
        return pl.BlockSpec(a.shape, lambda i, t: (0, 0))

    in_specs = [
        # data-dependent embedding row gather via the scalar-prefetched token
        pl.BlockSpec((1, 1, H), lambda i, t: (t[0], 0, 0)),
    ] + [full_block(a) for a in data[1:]]

    out_spec = pl.BlockSpec((1, P), lambda i, t: (0, 0))

    out = pl.pallas_call(
        functools.partial(decoder_kernel, H=H, L=L, V=V, P=P),
        out_shape=jax.ShapeDtypeStruct((1, P), jnp.float32),
        grid_spec=pltpu.PrefetchScalarGridSpec(
            num_scalar_prefetch=1,
            grid=(1,),
            in_specs=in_specs,
            out_specs=out_spec,
        ),
        compiler_params=pltpu.CompilerParams(
            dimension_semantics=("arbitrary",)),
    )(tok, *data)

    logp = out[:, :V]
    h_new = out[:, V:V + H]
    attn = out[:, V + H:V + H + L]
    return logp, h_new.reshape(1, 1, H), attn


def decoder_ref(tok, hidden, enc, params):
    """Pure-JAX reference mirroring the PyTorch forward."""
    H = hidden.shape[-1]
    e = params["emb"][tok[0]][None, :]
    h = hidden.reshape(1, H)
    cat1 = jnp.concatenate([e, h], axis=1)
    attn = jax.nn.softmax(cat1 @ params["att_w"].T + params["att_b"], axis=1)
    wa = attn @ enc
    cat2 = jnp.concatenate([e, wa], axis=1)
    x = jax.nn.relu(cat2 @ params["comb_w"].T + params["comb_b"])
    gi = x @ params["gru_w_ih"].T + params["gru_b_ih"]
    gh = h @ params["gru_w_hh"].T + params["gru_b_hh"]
    i_r, i_z, i_n = jnp.split(gi, 3, axis=1)
    h_r, h_z, h_n = jnp.split(gh, 3, axis=1)
    r = jax.nn.sigmoid(i_r + h_r)
    z = jax.nn.sigmoid(i_z + h_z)
    n = jnp.tanh(i_n + r * h_n)
    h_new = (1.0 - z) * n + z * h
    logp = jax.nn.log_softmax(h_new @ params["out_w"].T + params["out_b"], axis=1)
    return logp, h_new.reshape(1, 1, H), attn


if __name__ == "__main__":
    H, L, V = 32, 8, 16          # hidden_size, max_length, output_size
    key = jax.random.PRNGKey(0)
    ks = jax.random.split(key, 13)

    def uni(k, shape, fan_in):
        b = 1.0 / jnp.sqrt(jnp.float32(fan_in))
        return jax.random.uniform(k, shape, jnp.float32, -b, b)

    params = dict(
        emb=jax.random.normal(ks[0], (V, H), jnp.float32),      # nn.Embedding
        att_w=uni(ks[1], (L, 2 * H), 2 * H),                    # nn.Linear(2H, L)
        att_b=uni(ks[2], (L,), 2 * H),
        comb_w=uni(ks[3], (H, 2 * H), 2 * H),                   # nn.Linear(2H, H)
        comb_b=uni(ks[4], (H,), 2 * H),
        gru_w_ih=uni(ks[5], (3 * H, H), H),                     # nn.GRU(H, H)
        gru_w_hh=uni(ks[6], (3 * H, H), H),
        gru_b_ih=uni(ks[7], (3 * H,), H),
        gru_b_hh=uni(ks[8], (3 * H,), H),
        out_w=uni(ks[9], (V, H), H),                            # nn.Linear(H, V)
        out_b=uni(ks[10], (V,), H),
    )

    # one-time param packing (hoisted out of the per-step decode path)
    packed = pack_decoder_params(params)
    jax.block_until_ready(packed["w_out"])

    tok = jnp.array([3], dtype=jnp.int32)                       # x (token index)
    hidden = jax.random.normal(ks[11], (1, 1, H), jnp.float32)  # GRU hidden state
    enc = jax.random.normal(ks[12], (L, H), jnp.float32)        # encoder_outputs

    logp, h_new, attn = decoder_forward(tok, hidden, enc, packed)
    jax.block_until_ready((logp, h_new, attn))

    # verify against pure-JAX reference of the PyTorch forward
    logp_r, h_r, attn_r = decoder_ref(tok, hidden, enc, params)
    assert jnp.allclose(logp, logp_r, atol=1e-5), "log_softmax output mismatch"
    assert jnp.allclose(h_new, h_r, atol=1e-5), "hidden state mismatch"
    assert jnp.allclose(attn, attn_r, atol=1e-5), "attention weights mismatch"

    print("KERNEL_OK")
</pallas_src>

<mosaic_0001>
module attributes {stable_mosaic.version = 11 : i64} {
  func.func @decoder_kernel(%arg0: i32, %arg1: memref<1xi32, #tpu.memory_space<smem>>, %arg2: memref<1x1x32xf32, #tpu.memory_space<vmem>>, %arg3: memref<1x32xf32, #tpu.memory_space<vmem>>, %arg4: memref<8x32xf32, #tpu.memory_space<vmem>>, %arg5: memref<64x8xf32, #tpu.memory_space<vmem>>, %arg6: memref<64x32xf32, #tpu.memory_space<vmem>>, %arg7: memref<32x96xf32, #tpu.memory_space<vmem>>, %arg8: memref<32x96xf32, #tpu.memory_space<vmem>>, %arg9: memref<32x16xf32, #tpu.memory_space<vmem>>, %arg10: memref<8x128xf32, #tpu.memory_space<vmem>>, %arg11: memref<1x128xf32, #tpu.memory_space<vmem>>) attributes {dimension_semantics = [#tpu.dimension_semantics<arbitrary>], iteration_bounds = array<i64: 1>, scalar_prefetch = 1 : i64, scratch_operands = 0 : i64, tpu.core_type = #tpu.core_type<tc>, window_params = [{transform_indices = @transform_0, window_bounds = array<i64: 1, 1, 32>}, {pipeline_mode = #tpu.pipeline_mode<synchronous>, transform_indices = @transform_1, window_bounds = array<i64: 1, 32>}, {pipeline_mode = #tpu.pipeline_mode<synchronous>, transform_indices = @transform_2, window_bounds = array<i64: 8, 32>}, {pipeline_mode = #tpu.pipeline_mode<synchronous>, transform_indices = @transform_3, window_bounds = array<i64: 64, 8>}, {pipeline_mode = #tpu.pipeline_mode<synchronous>, transform_indices = @transform_4, window_bounds = array<i64: 64, 32>}, {pipeline_mode = #tpu.pipeline_mode<synchronous>, transform_indices = @transform_5, window_bounds = array<i64: 32, 96>}, {pipeline_mode = #tpu.pipeline_mode<synchronous>, transform_indices = @transform_6, window_bounds = array<i64: 32, 96>}, {pipeline_mode = #tpu.pipeline_mode<synchronous>, transform_indices = @transform_7, window_bounds = array<i64: 32, 16>}, {pipeline_mode = #tpu.pipeline_mode<synchronous>, transform_indices = @transform_8, window_bounds = array<i64: 8, 128>}, {pipeline_mode = #tpu.pipeline_mode<synchronous>, transform_indices = @transform_9, window_bounds = array<i64: 1, 128>}]} {
    %c0 = arith.constant 0 : index
    %c0_0 = arith.constant 0 : index
    %c0_1 = arith.constant 0 : index
    %0 = vector.load %arg2[%c0, %c0_0, %c0_1] : memref<1x1x32xf32, #tpu.memory_space<vmem>>, vector<1x1x32xf32>
    %1 = vector.shape_cast %0 : vector<1x1x32xf32> to vector<1x32xf32>
    %c0_2 = arith.constant 0 : index
    %c0_3 = arith.constant 0 : index
    %2 = vector.load %arg3[%c0_2, %c0_3] : memref<1x32xf32, #tpu.memory_space<vmem>>, vector<1x32xf32>
    %c0_4 = arith.constant 0 : index
    %c0_5 = arith.constant 0 : index
    %3 = vector.load %arg10[%c0_4, %c0_5] : memref<8x128xf32, #tpu.memory_space<vmem>>, vector<1x8xf32>
    %c1 = arith.constant 1 : index
    %c0_6 = arith.constant 0 : index
    %4 = vector.load %arg10[%c1, %c0_6] : memref<8x128xf32, #tpu.memory_space<vmem>>, vector<1x32xf32>
    %c2 = arith.constant 2 : index
    %c0_7 = arith.constant 0 : index
    %5 = vector.load %arg10[%c2, %c0_7] : memref<8x128xf32, #tpu.memory_space<vmem>>, vector<1x96xf32>
    %c3 = arith.constant 3 : index
    %c0_8 = arith.constant 0 : index
    %6 = vector.load %arg10[%c3, %c0_8] : memref<8x128xf32, #tpu.memory_space<vmem>>, vector<1x96xf32>
    %c4 = arith.constant 4 : index
    %c0_9 = arith.constant 0 : index
    %7 = vector.load %arg10[%c4, %c0_9] : memref<8x128xf32, #tpu.memory_space<vmem>>, vector<1x16xf32>
    %8 = tpu.concatenate %1, %2 in 1 : vector<1x32xf32>, vector<1x32xf32> -> vector<1x64xf32>
    %c0_10 = arith.constant 0 : index
    %c0_11 = arith.constant 0 : index
    %9 = vector.load %arg5[%c0_10, %c0_11] : memref<64x8xf32, #tpu.memory_space<vmem>>, vector<64x8xf32>
    %cst = arith.constant dense<0.000000e+00> : vector<1x8xf32>
    %10 = tpu.matmul %8, %9, %cst {dimension_numbers = #tpu.dot_dimension_numbers<[1], [0], [0], [1], [0, 0, 1, 1], [], []>} : vector<1x64xf32>, vector<64x8xf32>, vector<1x8xf32> -> vector<1x8xf32>
    %11 = arith.addf %10, %3 : vector<1x8xf32>
    %cst_12 = arith.constant dense<0xFF800000> : vector<1xf32>
    %12 = vector.multi_reduction <maximumf>, %11, %cst_12 [1] : vector<1x8xf32> to vector<1xf32>
    %13 = vector.shape_cast %12 : vector<1xf32> to vector<1x1xf32>
    %14 = vector.broadcast %13 : vector<1x1xf32> to vector<1x8xf32>
    %15 = arith.subf %11, %14 : vector<1x8xf32>
    %16 = math.exp %15 : vector<1x8xf32>
    %cst_13 = arith.constant dense<0.000000e+00> : vector<1xf32>
    %17 = vector.multi_reduction <add>, %16, %cst_13 [1] : vector<1x8xf32> to vector<1xf32>
    %18 = vector.shape_cast %17 : vector<1xf32> to vector<1x1xf32>
    %19 = vector.broadcast %18 : vector<1x1xf32> to vector<1x8xf32>
    %20 = arith.divf %16, %19 : vector<1x8xf32>
    %c0_14 = arith.constant 0 : index
    %c0_15 = arith.constant 0 : index
    %21 = vector.load %arg4[%c0_14, %c0_15] : memref<8x32xf32, #tpu.memory_space<vmem>>, vector<8x32xf32>
    %cst_16 = arith.constant dense<0.000000e+00> : vector<1x32xf32>
    %22 = tpu.matmul %20, %21, %cst_16 {dimension_numbers = #tpu.dot_dimension_numbers<[1], [0], [0], [1], [0, 0, 1, 1], [], []>} : vector<1x8xf32>, vector<8x32xf32>, vector<1x32xf32> -> vector<1x32xf32>
    %23 = tpu.concatenate %1, %22 in 1 : vector<1x32xf32>, vector<1x32xf32> -> vector<1x64xf32>
    %c0_17 = arith.constant 0 : index
    %c0_18 = arith.constant 0 : index
    %24 = vector.load %arg6[%c0_17, %c0_18] : memref<64x32xf32, #tpu.memory_space<vmem>>, vector<64x32xf32>
    %cst_19 = arith.constant dense<0.000000e+00> : vector<1x32xf32>
    %25 = tpu.matmul %23, %24, %cst_19 {dimension_numbers = #tpu.dot_dimension_numbers<[1], [0], [0], [1], [0, 0, 1, 1], [], []>} : vector<1x64xf32>, vector<64x32xf32>, vector<1x32xf32> -> vector<1x32xf32>
    %26 = arith.addf %25, %4 : vector<1x32xf32>
    %cst_20 = arith.constant 0.000000e+00 : f32
    %27 = vector.broadcast %cst_20 : f32 to vector<1x32xf32>
    %28 = arith.maximumf %26, %27 : vector<1x32xf32>
    %c0_21 = arith.constant 0 : index
    %c0_22 = arith.constant 0 : index
    %29 = vector.load %arg7[%c0_21, %c0_22] : memref<32x96xf32, #tpu.memory_space<vmem>>, vector<32x96xf32>
    %cst_23 = arith.constant dense<0.000000e+00> : vector<1x96xf32>
    %30 = tpu.matmul %28, %29, %cst_23 {dimension_numbers = #tpu.dot_dimension_numbers<[1], [0], [0], [1], [0, 0, 1, 1], [], []>} : vector<1x32xf32>, vector<32x96xf32>, vector<1x96xf32> -> vector<1x96xf32>
    %31 = arith.addf %30, %5 : vector<1x96xf32>
    %c0_24 = arith.constant 0 : index
    %c0_25 = arith.constant 0 : index
    %32 = vector.load %arg8[%c0_24, %c0_25] : memref<32x96xf32, #tpu.memory_space<vmem>>, vector<32x96xf32>
    %cst_26 = arith.constant dense<0.000000e+00> : vector<1x96xf32>
    %33 = tpu.matmul %2, %32, %cst_26 {dimension_numbers = #tpu.dot_dimension_numbers<[1], [0], [0], [1], [0, 0, 1, 1], [], []>} : vector<1x32xf32>, vector<32x96xf32>, vector<1x96xf32> -> vector<1x96xf32>
    %34 = arith.addf %33, %6 : vector<1x96xf32>
    %35 = vector.extract_strided_slice %31 {offsets = [0, 0], sizes = [1, 32], strides = [1, 1]} : vector<1x96xf32> to vector<1x32xf32>
    %36 = vector.extract_strided_slice %34 {offsets = [0, 0], sizes = [1, 32], strides = [1, 1]} : vector<1x96xf32> to vector<1x32xf32>
    %37 = arith.addf %35, %36 : vector<1x32xf32>
    %38 = arith.negf %37 : vector<1x32xf32>
    %39 = math.exp %38 : vector<1x32xf32>
    %cst_27 = arith.constant 1.000000e+00 : f32
    %40 = vector.broadcast %cst_27 : f32 to vector<1x32xf32>
    %41 = arith.addf %40, %39 : vector<1x32xf32>
    %42 = arith.divf %40, %41 : vector<1x32xf32>
    %43 = vector.extract_strided_slice %31 {offsets = [0, 32], sizes = [1, 32], strides = [1, 1]} : vector<1x96xf32> to vector<1x32xf32>
    %44 = vector.extract_strided_slice %34 {offsets = [0, 32], sizes = [1, 32], strides = [1, 1]} : vector<1x96xf32> to vector<1x32xf32>
    %45 = arith.addf %43, %44 : vector<1x32xf32>
    %46 = arith.negf %45 : vector<1x32xf32>
    %47 = math.exp %46 : vector<1x32xf32>
    %cst_28 = arith.constant 1.000000e+00 : f32
    %48 = vector.broadcast %cst_28 : f32 to vector<1x32xf32>
    %49 = arith.addf %48, %47 : vector<1x32xf32>
    %50 = arith.divf %48, %49 : vector<1x32xf32>
    %51 = vector.extract_strided_slice %31 {offsets = [0, 64], sizes = [1, 32], strides = [1, 1]} : vector<1x96xf32> to vector<1x32xf32>
    %52 = vector.extract_strided_slice %34 {offsets = [0, 64], sizes = [1, 32], strides = [1, 1]} : vector<1x96xf32> to vector<1x32xf32>
    %53 = arith.mulf %42, %52 : vector<1x32xf32>
    %54 = arith.addf %51, %53 : vector<1x32xf32>
    %55 = math.tanh %54 : vector<1x32xf32>
    %cst_29 = arith.constant 1.000000e+00 : f32
    %56 = vector.broadcast %cst_29 : f32 to vector<1x32xf32>
    %57 = arith.subf %56, %50 : vector<1x32xf32>
    %58 = arith.mulf %57, %55 : vector<1x32xf32>
    %59 = arith.mulf %50, %2 : vector<1x32xf32>
    %60 = arith.addf %58, %59 : vector<1x32xf32>
    %c0_30 = arith.constant 0 : index
    %c0_31 = arith.constant 0 : index
    %61 = vector.load %arg9[%c0_30, %c0_31] : memref<32x16xf32, #tpu.memory_space<vmem>>, vector<32x16xf32>
    %cst_32 = arith.constant dense<0.000000e+00> : vector<1x16xf32>
    %62 = tpu.matmul %60, %61, %cst_32 {dimension_numbers = #tpu.dot_dimension_numbers<[1], [0], [0], [1], [0, 0, 1, 1], [], []>} : vector<1x32xf32>, vector<32x16xf32>, vector<1x16xf32> -> vector<1x16xf32>
    %63 = arith.addf %62, %7 : vector<1x16xf32>
    %cst_33 = arith.constant dense<0xFF800000> : vector<1xf32>
    %64 = vector.multi_reduction <maximumf>, %63, %cst_33 [1] : vector<1x16xf32> to vector<1xf32>
    %65 = vector.shape_cast %64 : vector<1xf32> to vector<1x1xf32>
    %66 = vector.broadcast %65 : vector<1x1xf32> to vector<1x16xf32>
    %67 = arith.subf %63, %66 : vector<1x16xf32>
    %68 = math.exp %67 : vector<1x16xf32>
    %cst_34 = arith.constant dense<0.000000e+00> : vector<1xf32>
    %69 = vector.multi_reduction <add>, %68, %cst_34 [1] : vector<1x16xf32> to vector<1xf32>
    %70 = vector.shape_cast %69 : vector<1xf32> to vector<1x1xf32>
    %71 = math.log %70 : vector<1x1xf32>
    %72 = vector.broadcast %71 : vector<1x1xf32> to vector<1x16xf32>
    %73 = arith.subf %67, %72 : vector<1x16xf32>
    %cst_35 = arith.constant 0.000000e+00 : f32
    %74 = vector.broadcast %cst_35 : f32 to vector<1x72xf32>
    %75 = tpu.concatenate %73, %60, %20, %74 in 1 : vector<1x16xf32>, vector<1x32xf32>, vector<1x8xf32>, vector<1x72xf32> -> vector<1x128xf32>
    %c0_36 = arith.constant 0 : index
    %c0_37 = arith.constant 0 : index
    %76 = vector.load %arg11[%c0_36, %c0_37] : memref<1x128xf32, #tpu.memory_space<vmem>>, vector<1x128xf32>
    tpu.vector_store %arg11[%c0_36, %c0_37], %75 {strides = array<i32>} : memref<1x128xf32, #tpu.memory_space<vmem>>, vector<1x128xf32>,
    return
  }
  func.func @transform_0(%arg0: i32, %arg1: memref<1xi32, #tpu.memory_space<smem>>) -> (i32, i32, i32) {
    %c0 = arith.constant 0 : index
    %0 = memref.load %arg1[%c0] : memref<1xi32, #tpu.memory_space<smem>>
    %c0_i32 = arith.constant 0 : i32
    %c0_i32_0 = arith.constant 0 : i32
    %c0_i32_1 = arith.constant 0 : i32
    return %0, %c0_i32, %c0_i32_0 : i32, i32, i32
  }
  func.func @transform_1(%arg0: i32, %arg1: memref<1xi32, #tpu.memory_space<smem>>) -> (i32, i32) {
    %c0_i32 = arith.constant 0 : i32
    %c0_i32_0 = arith.constant 0 : i32
    %c0_i32_1 = arith.constant 0 : i32
    return %c0_i32, %c0_i32_0 : i32, i32
  }
  func.func @transform_2(%arg0: i32, %arg1: memref<1xi32, #tpu.memory_space<smem>>) -> (i32, i32) {
    %c0_i32 = arith.constant 0 : i32
    %c0_i32_0 = arith.constant 0 : i32
    %c0_i32_1 = arith.constant 0 : i32
    return %c0_i32, %c0_i32_0 : i32, i32
  }
  func.func @transform_3(%arg0: i32, %arg1: memref<1xi32, #tpu.memory_space<smem>>) -> (i32, i32) {
    %c0_i32 = arith.constant 0 : i32
    %c0_i32_0 = arith.constant 0 : i32
    %c0_i32_1 = arith.constant 0 : i32
    return %c0_i32, %c0_i32_0 : i32, i32
  }
  func.func @transform_4(%arg0: i32, %arg1: memref<1xi32, #tpu.memory_space<smem>>) -> (i32, i32) {
    %c0_i32 = arith.constant 0 : i32
    %c0_i32_0 = arith.constant 0 : i32
    %c0_i32_1 = arith.constant 0 : i32
    return %c0_i32, %c0_i32_0 : i32, i32
  }
  func.func @transform_5(%arg0: i32, %arg1: memref<1xi32, #tpu.memory_space<smem>>) -> (i32, i32) {
    %c0_i32 = arith.constant 0 : i32
    %c0_i32_0 = arith.constant 0 : i32
    %c0_i32_1 = arith.constant 0 : i32
    return %c0_i32, %c0_i32_0 : i32, i32
  }
  func.func @transform_6(%arg0: i32, %arg1: memref<1xi32, #tpu.memory_space<smem>>) -> (i32, i32) {
    %c0_i32 = arith.constant 0 : i32
    %c0_i32_0 = arith.constant 0 : i32
    %c0_i32_1 = arith.constant 0 : i32
    return %c0_i32, %c0_i32_0 : i32, i32
  }
  func.func @transform_7(%arg0: i32, %arg1: memref<1xi32, #tpu.memory_space<smem>>) -> (i32, i32) {
    %c0_i32 = arith.constant 0 : i32
    %c0_i32_0 = arith.constant 0 : i32
    %c0_i32_1 = arith.constant 0 : i32
    return %c0_i32, %c0_i32_0 : i32, i32
  }
  func.func @transform_8(%arg0: i32, %arg1: memref<1xi32, #tpu.memory_space<smem>>) -> (i32, i32) {
    %c0_i32 = arith.constant 0 : i32
    %c0_i32_0 = arith.constant 0 : i32
    %c0_i32_1 = arith.constant 0 : i32
    return %c0_i32, %c0_i32_0 : i32, i32
  }
  func.func @transform_9(%arg0: i32, %arg1: memref<1xi32, #tpu.memory_space<smem>>) -> (i32, i32) {
    %c0_i32 = arith.constant 0 : i32
    %c0_i32_0 = arith.constant 0 : i32
    %c0_i32_1 = arith.constant 0 : i32
    return %c0_i32, %c0_i32_0 : i32, i32
  }
}

</mosaic_0001>

<bundles_post_ra>
// kernel: tpu_custom_call.1
= control target key start
LH: loop header
LB: loop body
LE: loop exit
PB: predicated region body
PF: predicated region fallthrough
CT: control target
= control target key end

     0   :  { %v57_v0 = vlaneseq  ;;  %v785_v2 = vmov 0.0   ;;  %vm786_vm0 = vmmov 0   ;;  %s1031_s0 = inlined_call_operand.<no memory space> [shape: s32[1], index: 0, kind: input, shape index: {}]   ;;  %s1032_s1 = inlined_call_operand.vmem [shape: f32[16,1,32], index: 1, kind: input, shape index: {}]   ;;  %s1033_s2 = inlined_call_operand.vmem [shape: f32[1,32], index: 2, kind: input, shape index: {}]   ;;  %s1034_s3 = inlined_call_operand.vmem [shape: f32[8,32], index: 3, kind: input, shape index: {}]   ;;  %s1035_s4 = inlined_call_operand.vmem [shape: f32[64,8], index: 4, kind: input, shape index: {}]   ;;  %s1036_s5 = inlined_call_operand.vmem [shape: f32[64,32], index: 5, kind: input, shape index: {}]   ;;  %s1037_s6 = inlined_call_operand.vmem [shape: f32[32,96], index: 6, kind: input, shape index: {}]   ;;  %s1038_s7 = inlined_call_operand.vmem [shape: f32[32,96], index: 7, kind: input, shape index: {}]   ;;  %s1039_s8 = inlined_call_operand.vmem [shape: f32[32,16], index: 8, kind: input, shape index: {}]   ;;  %s1040_s9 = inlined_call_operand.vmem [shape: f32[8,128], index: 9, kind: input, shape index: {}]   ;;  %s1041_s10 = inlined_call_operand.hbm [shape: f32[1,128], index: 10, kind: output, shape index: {}]  }
   0x1   :  { %v73_v1 = vld [vmem:[%s1035_s4 + $0x38] sm:$0xff]  ;;  %665 = vmatprep.subr.mxu0 %v785_v2  ;;  %v72_v3 = vld [vmem:[%s1035_s4 + $0x30] sm:$0xff]  ;;  %684 = vmatprep.subr.mxu1 %v785_v2  ;;  %v861_v5 = vld [vmem:[%s1033_s2] sm:$0x1] }
   0x2   :  { %v58_v4 = vshrl.u32 %v57_v0, 7  ;;  %666 = vmatpush3.msra.mxu0 %v73_v1  ;;  %681 = vmatprep.mubr.msk.f32.mxu0 %vm786_vm0, %v785_v2  ;;  %v71_v6 = vld [vmem:[%s1035_s4 + $0x28] sm:$0xff] }
   0x3   :  { %667 = vmatprep.subr.mxu0 %v785_v2  ;;  %686 = vmatprep.mubr.msk.f32.mxu1 %vm786_vm0, %v785_v2 }
   0x4   :  { %16 = vsyncpa [#allocation5], 0  ;;  %v59_v7 = vsub.s32 0, %v58_v4  ;;  %668 = vmatpush3.msra.mxu0 %v72_v3  ;;  %v70_v8 = vld [vmem:[%s1035_s4 + $0x20] sm:$0xff]  ;;  %v69_v10 = vld [vmem:[%s1035_s4 + $0x18] sm:$0xff]  ;;  %s787_s24 = smov 32  }
   0x5   :  { %669 = vmatprep.subr.mxu0 %v785_v2  ;;  %v68_v11 = vld [vmem:[%s1035_s4 + $0x10] sm:$0xff]  ;;  %v67_v12 = vld [vmem:[%s1035_s4 + $0x8] sm:$0xff]  ;;  %v66_v13 = vld [vmem:[%s1035_s4] sm:$0xff]  ;;  %p45_p0 = scmp.lt.s32.totalorder %s1031_s0, 15  ;;  %vm64_vm1 = vcmask 261120   ;;  %vm74_vm2 = vcmask 523264  }
   0x6   :  { %v60_v9 = vrot.slane %v861_v5, %v59_v7  ;;  %670 = vmatpush3.msra.mxu0 %v71_v6  ;;  %v51_v17 = vld [vmem:[%s1040_s9] sm:$0x1]  ;;  %vm148_vm3 = vcmask 57344   ;;  %vm161_vm4 = vcmask 64512   ;;  %v247_v31 = vld [vmem:[%s1036_s5 + $0x38] sm:$0xff]  ;;  %v246_v32 = vld [vmem:[%s1036_s5 + $0x30] sm:$0xff] }
   0x7   :  { %671 = vmatprep.subr.mxu0 %v785_v2  ;;  %s1043_s0 = smov (!%p45_p0, %s1031_s0), 15  ;;  %v160_v27 = vld [vmem:[%s1034_s3] sm:$0xff]  ;;  %v245_v33 = vld [vmem:[%s1036_s5 + $0x28] sm:$0xff]  ;;  %v243_v35 = vld [vmem:[%s1036_s5 + $0x18] sm:$0xff]  ;;  %vm580_vm5 = vcmask 122880   ;;  %vm599_vm6 = vcmask 130048  }
   0x8   :  { %61 = vrot.lane.b32.xlu0 %v60_v9, %s787_s24  ;;  %672 = vmatpush3.msra.mxu0 %v70_v8  ;;  %s47_s17 = scalar_lea.vmem %s1032_s1, %s1043_s0  ;;  %v244_v34 = vld [vmem:[%s1036_s5 + $0x20] sm:$0xff]  ;;  %v242_v36 = vld [vmem:[%s1036_s5 + $0x10] sm:$0xff]  ;;  %v241_v37 = vld [vmem:[%s1036_s5 + $0x8] sm:$0xff]  ;;  %vm601_vm7 = vcmask 392192   ;;  %vm603_vm8 = vcmask 457728  }
   0x9   :  { %673 = vmatprep.subr.mxu0 %v785_v2  ;;  %v902_v14 = vld [vmem:[%s47_s17] sm:$0x1]  ;;  %685 = vmatpush3.msra.mxu1 %v160_v27  ;;  %v325_v39 = vld [vmem:[%s1037_s6 + $0x18] sm:$0xff]  ;;  %v401_v45 = vld [vmem:[%s1038_s7 + $0x10] sm:$0xff]  ;;  %s789_s17 = smov 96  }
   0xa   :  { %674 = vmatpush3.msra.mxu0 %v69_v10  ;;  %689 = vmatprep.subr.mxu1 %v785_v2  ;;  %v240_v38 = vld [vmem:[%s1036_s5] sm:$0xff]  ;;  %v402_v43 = vld [vmem:[%s1038_s7 + $0x18] sm:$0xff]  ;;  %v400_v46 = vld [vmem:[%s1038_s7 + $0x8] sm:$0xff] }
   0xb   :  { %675 = vmatprep.subr.mxu0 %v785_v2  ;;  %v399_v47 = vld [vmem:[%s1038_s7] sm:$0xff]  ;;  %v324_v48 = vld [vmem:[%s1037_s6 + $0x10] sm:$0xff]  ;;  %v323_v49 = vld [vmem:[%s1037_s6 + $0x8] sm:$0xff] }
   0xc   :  { %676 = vmatpush3.msra.mxu0 %v68_v11  ;;  %v322_v50 = vld [vmem:[%s1037_s6] sm:$0xff]  ;;  %s788_s6 = smov 64   ;;  %v504_v10 = vld [vmem:[%s1039_s8 + $0x18] sm:$0xff]  ;;  %v503_v11 = vld [vmem:[%s1039_s8 + $0x10] sm:$0xff] }
   0xd   :  { %677 = vmatprep.subr.mxu0 %v785_v2  ;;  %v52_v51 = vld [vmem:[%s1040_s9 + $0x1] sm:$0x1]  ;;  %v54_v56 = vld [vmem:[%s1040_s9 + $0x3] sm:$0x1]  ;;  %v53_v60 = vld [vmem:[%s1040_s9 + $0x2] sm:$0x1] }
   0xe   :  { %678 = vmatpush3.msra.mxu0 %v67_v12  ;;  %v502_v12 = vld [vmem:[%s1039_s8 + $0x8] sm:$0xff] }
   0xf   :  { %679 = vmatprep.subr.mxu0 %v785_v2 }
  0x10   :  { %680 = vmatpush3.msra.mxu0 %v66_v13  ;;  %v501_v13 = vld [vmem:[%s1039_s8] sm:$0xff]  ;;  %s790_s8 = smov 112  }
  0x11   :  { %708 = vmatprep.subr.mxu0 %v785_v2 }
  0x7a   :  { %v904_v15 = vpop.permute.xlu0 %61 }
  0x7b   :  { %v65_v16 = vsel %vm64_vm1, %v902_v14, %v904_v15 }
  0x7c   :  { %682 = vmatmul.mubr.msk.f32.vlgmr.msra.gmra.mxu0 %vm74_vm2, %v65_v16 }
  0x7d   :  { %716 = vmatprep.mubr.msk.f32.mxu0 %vm786_vm0, %v785_v2  ;;  %709 = vmatpush3.msra.mxu0 %v325_v39 }
  0x7e   :  { %710 = vmatprep.subr.mxu0 %v785_v2 }
  0x7f   :  { %711 = vmatpush3.msra.mxu0 %v324_v48 }
  0x80   :  { %712 = vmatprep.subr.mxu0 %v785_v2 }
  0x81   :  { %713 = vmatpush3.msra.mxu0 %v323_v49 }
  0x82   :  { %714 = vmatprep.subr.mxu0 %v785_v2 }
  0x83   :  { %715 = vmatpush3.msra.mxu0 %v322_v50 }
  0x84   :  { %730 = vmatprep.subr.mxu0 %v785_v2 }
 0x13c   :  { %v144_v18 = vpop.f32.mrf.mxu0 }
 0x13d   :  { %v145_v19 = vadd.f32 %v144_v18, %v51_v17 }
 0x13e   :  { %v683_v20 = vpop.f32.mrf.mxu0 }
 0x13f   :  { %v149_v21 = vsel %vm148_vm3, %v145_v19, -inf }
 0x140   :  { %150 = vmax.xlane.f32.xlu0 %v149_v21 }
 0x1c9   :  { %v151_v22 = vpop.xlane.xlu0 %150 }
 0x1ca   :  { %v152_v23 = vsub.f32 %v145_v19, %v151_v22  ;;  %v55_v22 = vld [vmem:[%s1040_s9 + $0x4] sm:$0x1]  ;;  %s792_s9 = smov [#allocation4]  }
 0x1cb   :  { %s612_s18 = sshll.u32 %s792_s9, 4  ;;  %s613_s18 = int_to_ptr.vmem [resolvable:$true] %s612_s18 }
 0x1cc   :  { %v153_v24 = vmul.f32 1.442695, %v152_v23  ;;  %s763_s0 = scalar_lea.vmem %s613_s18, 16  ;;  %s767_s1 = scalar_lea.vmem %s613_s18, 32 }
 0x1cd   :  { %p764_p1 = scmp.ne.s32.totalorder %s613_s18, %s763_s0  ;;  %p768_p2 = scmp.lt.s32.totalorder %s613_s18, %s613_s18 }
 0x1ce   :  { %749 = vpow2.f32 %v153_v24  ;;  %p769_p3 = scmp.lt.s32.totalorder %s767_s1, %s763_s0 }
 0x1d0   :  { %p770_p4 = por %p769_p3, %p768_p2 }
 0x1d2   :  { %p771_p5 = pnand %p770_p4, %p764_p1 }
 0x1db   :  { %v750_v25 = vpop.eup %749 }
 0x1dc   :  { %v155_v26 = vsel %vm148_vm3, %v750_v25, 0.0 }
 0x1dd   :  { %156 = vadd.xlane.f32.xlu1 %v155_v26 }
 0x266   :  { %v157_v28 = vpop.xlane.xlu1 %156 }
 0x267   :  { %751 = vrcp.f32 %v157_v28 }
 0x274   :  { %v752_v29 = vpop.eup %751 }
 0x275   :  { %v919_v30 = vmul.f32 %v752_v29, %v750_v25 }
 0x277   :  { %687 = vmatmul.mubr.msk.f32.vlgmr.msra.gmra.mxu1 %vm161_vm4, %v919_v30 }
 0x278   :  { %705 = vmatprep.mubr.msk.f32.mxu1 %vm786_vm0, %v785_v2  ;;  %690 = vmatpush3.msra.mxu1 %v247_v31 }
 0x279   :  { %691 = vmatprep.subr.mxu1 %v785_v2 }
 0x27a   :  { %692 = vmatpush3.msra.mxu1 %v246_v32 }
 0x27b   :  { %693 = vmatprep.subr.mxu1 %v785_v2 }
 0x27c   :  { %694 = vmatpush3.msra.mxu1 %v245_v33 }
 0x27d   :  { %695 = vmatprep.subr.mxu1 %v785_v2 }
 0x27e   :  { %696 = vmatpush3.msra.mxu1 %v244_v34 }
 0x27f   :  { %697 = vmatprep.subr.mxu1 %v785_v2 }
 0x280   :  { %698 = vmatpush3.msra.mxu1 %v243_v35 }
 0x281   :  { %699 = vmatprep.subr.mxu1 %v785_v2 }
 0x282   :  { %700 = vmatpush3.msra.mxu1 %v242_v36 }
 0x283   :  { %701 = vmatprep.subr.mxu1 %v785_v2 }
 0x284   :  { %702 = vmatpush3.msra.mxu1 %v241_v37 }
 0x285   :  { %703 = vmatprep.subr.mxu1 %v785_v2 }
 0x286   :  { %704 = vmatpush3.msra.mxu1 %v240_v38 }
 0x287   :  { %719 = vmatprep.subr.mxu1 %v785_v2 }
 0x337   :  { %v231_v40 = vpop.f32.mrf.mxu1 }
 0x338   :  { %236 = vrot.lane.b32.xlu1 %v231_v40, %s787_s24  ;;  %s791_s24 = smov 48  }
 0x339   :  { %v688_v41 = vpop.f32.mrf.mxu1 }
 0x3aa   :  { %v237_v42 = vpop.permute.xlu1 %236 }
 0x3ab   :  { %v239_v44 = vsel %vm64_vm1, %v902_v14, %v237_v42 }
 0x3ac   :  { %706 = vmatmul.mubr.msk.f32.vlgmr.msra.gmra.mxu1 %vm74_vm2, %v239_v44 }
 0x3ad   :  { %720 = vmatpush3.msra.mxu1 %v402_v43  ;;  %727 = vmatprep.mubr.msk.f32.mxu1 %vm786_vm0, %v785_v2 }
 0x3ae   :  { %721 = vmatprep.subr.mxu1 %v785_v2 }
 0x3af   :  { %722 = vmatpush3.msra.mxu1 %v401_v45 }
 0x3b0   :  { %723 = vmatprep.subr.mxu1 %v785_v2 }
 0x3b1   :  { %724 = vmatpush3.msra.mxu1 %v400_v46 }
 0x3b2   :  { %725 = vmatprep.subr.mxu1 %v785_v2 }
 0x3b3   :  { %726 = vmatpush3.msra.mxu1 %v399_v47 }
 0x3b4   :  { %728 = vmatmul.mubr.msk.f32.vlgmr.msra.gmra.mxu1 %vm64_vm1, %v861_v5 }
 0x46c   :  { %v317_v52 = vpop.f32.mrf.mxu1 }
 0x46d   :  { %v318_v53 = vadd.f32 %v317_v52, %v52_v51 }
 0x46e   :  { %v707_v54 = vpop.f32.mrf.mxu1 }
 0x46f   :  { %v321_v55 = vmax.f32 %v318_v53, 0.0 }
 0x471   :  { %717 = vmatmul.mubr.msk.f32.vlgmr.msra.gmra.mxu0 %vm64_vm1, %v321_v55 }
 0x472   :  { %738 = vmatprep.mubr.msk.f32.mxu0 %vm786_vm0, %v785_v2  ;;  %731 = vmatpush3.msra.mxu0 %v504_v10 }
 0x473   :  { %732 = vmatprep.subr.mxu0 %v785_v2 }
 0x474   :  { %v471_v57 = vpop.f32.mrf.mxu1  ;;  %733 = vmatpush3.msra.mxu0 %v503_v11 }
 0x475   :  { %v472_v58 = vadd.f32 %v471_v57, %v54_v56  ;;  %734 = vmatprep.subr.mxu0 %v785_v2 }
 0x476   :  { %v729_v59 = vpop.f32.mrf.mxu1  ;;  %735 = vmatpush3.msra.mxu0 %v502_v12 }
 0x477   :  { %483 = vrot.lane.b32.xlu1 %v472_v58, %s788_s6  ;;  %736 = vmatprep.subr.mxu0 %v785_v2 }
 0x478   :  { %737 = vmatpush3.msra.mxu0 %v501_v13 }
 0x4e9   :  { %v484_v5 = vpop.permute.xlu1 %483 }
 0x531   :  { %v395_v61 = vpop.f32.mrf.mxu0 }
 0x532   :  { %v396_v62 = vadd.f32 %v395_v61, %v53_v60 }
 0x533   :  { %v718_v63 = vpop.f32.mrf.mxu0 }
 0x534   :  { %v475_v0 = vadd.f32 %v472_v58, %v396_v62 }
 0x536   :  { %v628_v1 = vmul.f32 -1.442695, %v475_v0 }
 0x538   :  { %753 = vpow2.f32 %v628_v1 }
 0x545   :  { %v754_v3 = vpop.eup %753 }
 0x546   :  { %v479_v4 = vadd.f32 1.0, %v754_v3 }
 0x548   :  { %755 = vrcp.f32 %v479_v4 }
 0x555   :  { %v756_v6 = vpop.eup %755 }
 0x556   :  { %v486_v7 = vmul.f32 %v756_v6, %v484_v5  ;;  %v493_v16 = vsub.f32 1.0, %v756_v6  ;;  %v499_v18 = vmul.f32 %v756_v6, %v904_v15 }
 0x558   :  { %488 = vrot.lane.b32.xlu1 %v486_v7, %s788_s6 }
 0x5ca   :  { %v489_v8 = vpop.permute.xlu1 %488 }
 0x5cb   :  { %v491_v9 = vadd.f32 %v489_v8, %v396_v62 }
 0x5cd   :  { %757 = vtanh.f32 %v491_v9 }
 0x5da   :  { %v758_v14 = vpop.eup %757 }
 0x5db   :  { %495 = vrot.lane.b32.xlu1 %v758_v14, %s789_s17 }
 0x64d   :  { %v496_v17 = vpop.permute.xlu1 %495 }
 0x64e   :  { %v498_v19 = vmul.f32 %v496_v17, %v493_v16 }
 0x650   :  { %v500_v20 = vadd.f32 %v499_v18, %v498_v19 }
 0x652   :  { %506 = vrot.lane.b32.xlu1 %v500_v20, %s789_s17 }
 0x6c4   :  { %v507_v21 = vpop.permute.xlu1 %506 }
 0x6c5   :  { %739 = vmatmul.mubr.msk.f32.vlgmr.msra.gmra.mxu0 %vm64_vm1, %v507_v21 }
 0x785   :  { %v576_v23 = vpop.f32.mrf.mxu0 }
 0x786   :  { %v577_v2 = vadd.f32 %v576_v23, %v55_v22 }
 0x787   :  { %v740_v24 = vpop.f32.mrf.mxu0 }
 0x788   :  { %v581_v25 = vsel %vm580_vm5, %v577_v2, -inf }
 0x789   :  { %582 = vmax.xlane.f32.xlu0 %v581_v25 }
 0x79f   :  { %593 = vrot.lane.b32.xlu0 %v500_v20, %s790_s8 }
 0x7a3   :  { %596 = vrot.lane.b32.xlu0 %v919_v30, %s791_s24 }
 0x812   :  { %v583_v15 = vpop.xlane.xlu0 %582 }
 0x813   :  { %v584_v26 = vsub.f32 %v577_v2, %v583_v15 }
 0x815   :  { %v585_v27 = vmul.f32 1.442695, %v584_v26 }
 0x816   :  { %v594_v32 = vpop.permute.xlu0 %593 }
 0x817   :  { %759 = vpow2.f32 %v585_v27 }
 0x81a   :  { %v597_v36 = vpop.permute.xlu0 %596 }
 0x824   :  { %v760_v28 = vpop.eup %759 }
 0x825   :  { %v587_v29 = vsel %vm580_vm5, %v760_v28, 0.0 }
 0x826   :  { %588 = vadd.xlane.f32.xlu1 %v587_v29 }
 0x8af   :  { %v589_v31 = vpop.xlane.xlu1 %588 }
 0x8b0   :  { %761 = vlog2.f32 %v589_v31 }
 0x8bd   :  { %v762_v33 = vpop.eup %761 }
 0x8be   :  { %v591_v34 = vmul.f32 0.6931472, %v762_v33 }
 0x8c0   :  { %v592_v35 = vsub.f32 %v584_v26, %v591_v34 }
 0x8c2   :  { %v600_v30 = vsel %vm599_vm6, %v592_v35, %v594_v32 }
 0x8c3   :  { %v602_v37 = vsel %vm601_vm7, %v600_v30, %v597_v36 }
 0x8c4   :  { %v604_v38 = vsel %vm603_vm8, %v602_v37, 0.0 }
 0x8c5   :  { %605 = vst [vmem:[#allocation4] sm:$0x1] %v604_v38 }
 0x8c6   :  { %774 = shalt.err (!%p771_p5)
}
 0x8c7   :  { %615 = dma.vmem_to_hbm [thread:$0]  %s613_s18, 16, %s1041_s10, [#allocation5]  }
 0x8c8   :  { %783 = dma.done.wait [#allocation5], 16  }
 0x8c9   :  { %784 = vsyncadd [#allocation5], 4294967280 }
 0x8ca   :  { %619 = vsyncpa [#allocation5], 1 }

</bundles_post_ra>
